<compile_context>
chip_gen: v7x
topology: tpu7x:2x2x1
jax: 0.10.0
libtpu: 0.0.40
codegen_flags: <defaults>
</compile_context>

<pallas_src>
import jax
import jax.numpy as jnp
from jax.experimental import pallas as pl
from jax.experimental.pallas import tpu as pltpu

# Module constants from the PyTorch spec:
#   nn.Conv2d(n_in, 16, 8, stride=4) ; nn.Conv2d(16, 32, 4, stride=2)
K1, S1 = 8, 4
K2, S2 = 4, 2


def _make_small_cnn_kernel(n, ow1, k2, co1):
    """Build the fused forward kernel for a static (batch, conv1-width, conv2-kernel, conv2-cin) config."""
    # (h1 row offset, window column offset) for each of the k2*k2 used conv1
    # positions.  h1 rows are (oh, ow, n)-major; window columns are
    # (kh, kw, c)-major, matching the pre-flattened W2 row order.
    used_taps = [((kh * ow1 + kw) * n, (kh * k2 + kw) * co1)
                 for kh in range(k2) for kw in range(k2)]

    def kernel(p1_ref, w1_ref, b1_ref, w2_ref, b2_ref, w3_ref, b3_ref,
               o_ref, h1_ref, win_ref):
        # --- Conv1 as one MXU matmul: (25N, 256) @ (256, 16), fused bias + ReLU.
        h1 = jnp.dot(p1_ref[...], w1_ref[...],
                     preferred_element_type=jnp.float32)
        h1_ref[...] = jnp.maximum(h1 + b1_ref[...], 0.0)      # stays in VMEM

        # --- Assemble conv2's single 4x4 receptive-field window as a
        #     lane-contiguous (N, 256) block: 16 tiny static copies
        #     (no matmuls, no serial accumulation chain).
        for r0, c0 in used_taps:
            win_ref[:, c0:c0 + co1] = h1_ref[r0:r0 + n, :]

        # --- Conv2 as ONE matmul: (N, 256) @ (256, 32), fused bias + ReLU.
        h2 = jnp.dot(win_ref[...], w2_ref[...],
                     preferred_element_type=jnp.float32)
        h2 = jnp.maximum(h2 + b2_ref[...], 0.0)

        # --- FC head; the reference forward() applies ReLU to the output too.
        out = jnp.dot(h2, w3_ref[...], preferred_element_type=jnp.float32)
        o_ref[...] = jnp.maximum(out + b3_ref[...], 0.0).astype(o_ref.dtype)

    return kernel


def prepare_params(params):
    """One-time weight/bias layout prep (hoisted out of the per-call path)."""
    w1, b1, w2, b2, w3, b3 = params
    co1, cin, k1, _ = w1.shape          # (16, 4, 8, 8)
    co2, c2in, k2, _ = w2.shape         # (32, 16, 4, 4)
    assert (k1, k2) == (K1, K2) and c2in == co1

    # conv1 weight: columns (c, kh, kw)-major == conv_general_dilated_patches
    # feature order.
    w1m = jnp.asarray(w1).reshape(co1, cin * k1 * k1).T                 # (256, 16)
    # conv2 weight flattened tap-major (kh, kw, c) to match the in-kernel
    # window assembly — conv2 becomes a single dense (256, 32) projection.
    w2f = jnp.asarray(w2).transpose(2, 3, 1, 0).reshape(k2 * k2 * co1, co2)  # (256, 32)
    w3m = jnp.asarray(w3).T                                             # (32, n_out)
    b1r = jnp.asarray(b1).reshape(1, -1)
    b2r = jnp.asarray(b2).reshape(1, -1)
    b3r = jnp.asarray(b3).reshape(1, -1)
    return (w1m, b1r, w2f, b2r, w3m, b3r)


def small_cnn_forward(x, prepared):
    """relu(fc(relu(conv2(relu(conv1(x)))))) with a single grid-less pallas_call."""
    w1m, b1r, w2f, b2r, w3m, b3r = prepared
    n, cin, h, w = x.shape
    kdim, co1 = w1m.shape
    co2 = w2f.shape[1]
    n_out = w3m.shape[1]
    assert kdim == cin * K1 * K1

    oh1 = (h - K1) // S1 + 1
    ow1 = (w - K1) // S1 + 1
    # Fused kernel assumes conv2 collapses to one spatial position
    # (true for the module's expected (N, 4, 24, 24) input).
    assert (oh1 - K2) // S2 + 1 == 1 and (ow1 - K2) // S2 + 1 == 1
    assert w2f.shape[0] == K2 * K2 * co1

    # conv1 im2col in a single XLA op.  Output (N, cin*K1*K1, OH, OW) with the
    # feature dim channel-major (c, kh, kw) == w1.reshape(co1, -1) column order.
    p1 = jax.lax.conv_general_dilated_patches(
        x, filter_shape=(K1, K1), window_strides=(S1, S1), padding="VALID")
    # Rows (oh, ow, n)-major so every conv2 tap is a contiguous n-row block of
    # h1 inside the kernel (this layout is what the tap offsets assume).
    p1 = p1.transpose(2, 3, 0, 1).reshape(oh1 * ow1 * n, kdim)

    rows = oh1 * ow1 * n
    kernel = _make_small_cnn_kernel(n, ow1, K2, co1)
    vmem = pl.BlockSpec(memory_space=pltpu.MemorySpace.VMEM)

    return pl.pallas_call(
        kernel,
        out_shape=jax.ShapeDtypeStruct((n, n_out), jnp.float32),
        in_specs=[vmem] * 7,
        out_specs=vmem,
        scratch_shapes=[
            pltpu.VMEM((rows, co1), jnp.float32),           # h1 (25N, 16)
            pltpu.VMEM((n, K2 * K2 * co1), jnp.float32),    # conv2 window (N, 256)
        ],
    )(p1, w1m, b1r, w2f, b2r, w3m, b3r)


def _reference_forward(x, params):
    """Pure-JAX reference (lax convs, HIGHEST precision) for correctness checking."""
    w1, b1, w2, b2, w3, b3 = params
    dn = ("NCHW", "OIHW", "NCHW")
    hp = jax.lax.Precision.HIGHEST
    h = jax.lax.conv_general_dilated(x, w1, (S1, S1), "VALID",
                                     dimension_numbers=dn, precision=hp)
    h = jnp.maximum(h + b1[None, :, None, None], 0.0)
    h = jax.lax.conv_general_dilated(h, w2, (S2, S2), "VALID",
                                     dimension_numbers=dn, precision=hp)
    h = jnp.maximum(h + b2[None, :, None, None], 0.0)
    h = h.reshape(h.shape[0], -1)
    return jnp.maximum(jnp.dot(h, w3.T, precision=hp) + b3[None, :], 0.0)


def init_params(key, n_input_channels=4, n_output_channels=24, bias=0.1):
    """Deterministic synthetic init (LeCun-normal-ish scales, constant bias)."""
    k1, k2, k3 = jax.random.split(key, 3)
    w1 = jax.random.normal(k1, (16, n_input_channels, K1, K1), jnp.float32)
    w1 = w1 / jnp.sqrt(n_input_channels * K1 * K1)
    b1 = jnp.full((16,), bias, jnp.float32)
    w2 = jax.random.normal(k2, (32, 16, K2, K2), jnp.float32)
    w2 = w2 / jnp.sqrt(16 * K2 * K2)
    b2 = jnp.full((32,), bias, jnp.float32)
    w3 = jax.random.normal(k3, (n_output_channels, 32), jnp.float32)
    w3 = w3 / jnp.sqrt(32)
    b3 = jnp.full((n_output_channels,), bias, jnp.float32)
    return (w1, b1, w2, b2, w3, b3)


if __name__ == "__main__":
    key = jax.random.PRNGKey(0)
    k_params, k_x = jax.random.split(key)

    params = init_params(k_params)
    # Module expects input shape (N, 4, 24, 24); small batch N=2.
    x = jax.random.normal(k_x, (2, 4, 24, 24), jnp.float32)

    prepared = prepare_params(params)          # one-time layout prep, not per call
    fwd = jax.jit(small_cnn_forward)
    out = jax.block_until_ready(fwd(x, prepared))

    assert out.shape == (2, 24), out.shape
    assert bool(jnp.all(out >= 0.0))           # ReLU'd output

    ref = jax.block_until_ready(_reference_forward(x, params))
    assert bool(jnp.allclose(out, ref, atol=1e-4, rtol=1e-4)), (
        float(jnp.max(jnp.abs(out - ref))))

    print("KERNEL_OK")
</pallas_src>

<mosaic_0001>
module attributes {stable_mosaic.version = 11 : i64} {
  func.func @kernel(%arg0: memref<50x256xf32, #tpu.memory_space<vmem>>, %arg1: memref<256x16xf32, #tpu.memory_space<vmem>>, %arg2: memref<1x16xf32, #tpu.memory_space<vmem>>, %arg3: memref<256x32xf32, #tpu.memory_space<vmem>>, %arg4: memref<1x32xf32, #tpu.memory_space<vmem>>, %arg5: memref<32x24xf32, #tpu.memory_space<vmem>>, %arg6: memref<1x24xf32, #tpu.memory_space<vmem>>, %arg7: memref<2x24xf32, #tpu.memory_space<vmem>>, %arg8: memref<50x16xf32, #tpu.memory_space<vmem>>, %arg9: memref<2x256xf32, #tpu.memory_space<vmem>>) attributes {dimension_semantics = [], scalar_prefetch = 0 : i64, scratch_operands = 2 : i64, tpu.core_type = #tpu.core_type<tc>} {
    %c0 = arith.constant 0 : index
    %c0_0 = arith.constant 0 : index
    %0 = vector.load %arg0[%c0, %c0_0] : memref<50x256xf32, #tpu.memory_space<vmem>>, vector<50x256xf32>
    %c0_1 = arith.constant 0 : index
    %c0_2 = arith.constant 0 : index
    %1 = vector.load %arg1[%c0_1, %c0_2] : memref<256x16xf32, #tpu.memory_space<vmem>>, vector<256x16xf32>
    %cst = arith.constant dense<0.000000e+00> : vector<50x16xf32>
    %2 = tpu.matmul %0, %1, %cst {dimension_numbers = #tpu.dot_dimension_numbers<[1], [0], [0], [1], [0, 0, 1, 1], [], []>} : vector<50x256xf32>, vector<256x16xf32>, vector<50x16xf32> -> vector<50x16xf32>
    %c0_3 = arith.constant 0 : index
    %c0_4 = arith.constant 0 : index
    %3 = vector.load %arg2[%c0_3, %c0_4] : memref<1x16xf32, #tpu.memory_space<vmem>>, vector<1x16xf32>
    %4 = vector.broadcast %3 : vector<1x16xf32> to vector<50x16xf32>
    %5 = arith.addf %2, %4 : vector<50x16xf32>
    %cst_5 = arith.constant 0.000000e+00 : f32
    %6 = vector.broadcast %cst_5 : f32 to vector<50x16xf32>
    %7 = arith.maximumf %5, %6 : vector<50x16xf32>
    %c0_6 = arith.constant 0 : index
    %c0_7 = arith.constant 0 : index
    %8 = vector.load %arg8[%c0_6, %c0_7] : memref<50x16xf32, #tpu.memory_space<vmem>>, vector<50x16xf32>
    tpu.vector_store %arg8[%c0_6, %c0_7], %7 {strides = array<i32>} : memref<50x16xf32, #tpu.memory_space<vmem>>, vector<50x16xf32>,
    %c0_8 = arith.constant 0 : index
    %c0_9 = arith.constant 0 : index
    %9 = vector.load %arg8[%c0_8, %c0_9] : memref<50x16xf32, #tpu.memory_space<vmem>>, vector<2x16xf32>
    %c0_10 = arith.constant 0 : index
    %c0_11 = arith.constant 0 : index
    %10 = vector.load %arg9[%c0_10, %c0_11] : memref<2x256xf32, #tpu.memory_space<vmem>>, vector<2x16xf32>
    tpu.vector_store %arg9[%c0_10, %c0_11], %9 {strides = array<i32>} : memref<2x256xf32, #tpu.memory_space<vmem>>, vector<2x16xf32>,
    %c2 = arith.constant 2 : index
    %c0_12 = arith.constant 0 : index
    %11 = vector.load %arg8[%c2, %c0_12] : memref<50x16xf32, #tpu.memory_space<vmem>>, vector<2x16xf32>
    %c0_13 = arith.constant 0 : index
    %c16 = arith.constant 16 : index
    %12 = vector.load %arg9[%c0_13, %c16] : memref<2x256xf32, #tpu.memory_space<vmem>>, vector<2x16xf32>
    tpu.vector_store %arg9[%c0_13, %c16], %11 {strides = array<i32>} : memref<2x256xf32, #tpu.memory_space<vmem>>, vector<2x16xf32>,
    %c4 = arith.constant 4 : index
    %c0_14 = arith.constant 0 : index
    %13 = vector.load %arg8[%c4, %c0_14] : memref<50x16xf32, #tpu.memory_space<vmem>>, vector<2x16xf32>
    %c0_15 = arith.constant 0 : index
    %c32 = arith.constant 32 : index
    %14 = vector.load %arg9[%c0_15, %c32] : memref<2x256xf32, #tpu.memory_space<vmem>>, vector<2x16xf32>
    tpu.vector_store %arg9[%c0_15, %c32], %13 {strides = array<i32>} : memref<2x256xf32, #tpu.memory_space<vmem>>, vector<2x16xf32>,
    %c6 = arith.constant 6 : index
    %c0_16 = arith.constant 0 : index
    %15 = vector.load %arg8[%c6, %c0_16] : memref<50x16xf32, #tpu.memory_space<vmem>>, vector<2x16xf32>
    %c0_17 = arith.constant 0 : index
    %c48 = arith.constant 48 : index
    %16 = vector.load %arg9[%c0_17, %c48] : memref<2x256xf32, #tpu.memory_space<vmem>>, vector<2x16xf32>
    tpu.vector_store %arg9[%c0_17, %c48], %15 {strides = array<i32>} : memref<2x256xf32, #tpu.memory_space<vmem>>, vector<2x16xf32>,
    %c10 = arith.constant 10 : index
    %c0_18 = arith.constant 0 : index
    %17 = vector.load %arg8[%c10, %c0_18] : memref<50x16xf32, #tpu.memory_space<vmem>>, vector<2x16xf32>
    %c0_19 = arith.constant 0 : index
    %c64 = arith.constant 64 : index
    %18 = vector.load %arg9[%c0_19, %c64] : memref<2x256xf32, #tpu.memory_space<vmem>>, vector<2x16xf32>
    tpu.vector_store %arg9[%c0_19, %c64], %17 {strides = array<i32>} : memref<2x256xf32, #tpu.memory_space<vmem>>, vector<2x16xf32>,
    %c12 = arith.constant 12 : index
    %c0_20 = arith.constant 0 : index
    %19 = vector.load %arg8[%c12, %c0_20] : memref<50x16xf32, #tpu.memory_space<vmem>>, vector<2x16xf32>
    %c0_21 = arith.constant 0 : index
    %c80 = arith.constant 80 : index
    %20 = vector.load %arg9[%c0_21, %c80] : memref<2x256xf32, #tpu.memory_space<vmem>>, vector<2x16xf32>
    tpu.vector_store %arg9[%c0_21, %c80], %19 {strides = array<i32>} : memref<2x256xf32, #tpu.memory_space<vmem>>, vector<2x16xf32>,
    %c14 = arith.constant 14 : index
    %c0_22 = arith.constant 0 : index
    %21 = vector.load %arg8[%c14, %c0_22] : memref<50x16xf32, #tpu.memory_space<vmem>>, vector<2x16xf32>
    %c0_23 = arith.constant 0 : index
    %c96 = arith.constant 96 : index
    %22 = vector.load %arg9[%c0_23, %c96] : memref<2x256xf32, #tpu.memory_space<vmem>>, vector<2x16xf32>
    tpu.vector_store %arg9[%c0_23, %c96], %21 {strides = array<i32>} : memref<2x256xf32, #tpu.memory_space<vmem>>, vector<2x16xf32>,
    %c16_24 = arith.constant 16 : index
    %c0_25 = arith.constant 0 : index
    %23 = vector.load %arg8[%c16_24, %c0_25] : memref<50x16xf32, #tpu.memory_space<vmem>>, vector<2x16xf32>
    %c0_26 = arith.constant 0 : index
    %c112 = arith.constant 112 : index
    %24 = vector.load %arg9[%c0_26, %c112] : memref<2x256xf32, #tpu.memory_space<vmem>>, vector<2x16xf32>
    tpu.vector_store %arg9[%c0_26, %c112], %23 {strides = array<i32>} : memref<2x256xf32, #tpu.memory_space<vmem>>, vector<2x16xf32>,
    %c20 = arith.constant 20 : index
    %c0_27 = arith.constant 0 : index
    %25 = vector.load %arg8[%c20, %c0_27] : memref<50x16xf32, #tpu.memory_space<vmem>>, vector<2x16xf32>
    %c0_28 = arith.constant 0 : index
    %c128 = arith.constant 128 : index
    %26 = vector.load %arg9[%c0_28, %c128] : memref<2x256xf32, #tpu.memory_space<vmem>>, vector<2x16xf32>
    tpu.vector_store %arg9[%c0_28, %c128], %25 {strides = array<i32>} : memref<2x256xf32, #tpu.memory_space<vmem>>, vector<2x16xf32>,
    %c22 = arith.constant 22 : index
    %c0_29 = arith.constant 0 : index
    %27 = vector.load %arg8[%c22, %c0_29] : memref<50x16xf32, #tpu.memory_space<vmem>>, vector<2x16xf32>
    %c0_30 = arith.constant 0 : index
    %c144 = arith.constant 144 : index
    %28 = vector.load %arg9[%c0_30, %c144] : memref<2x256xf32, #tpu.memory_space<vmem>>, vector<2x16xf32>
    tpu.vector_store %arg9[%c0_30, %c144], %27 {strides = array<i32>} : memref<2x256xf32, #tpu.memory_space<vmem>>, vector<2x16xf32>,
    %c24 = arith.constant 24 : index
    %c0_31 = arith.constant 0 : index
    %29 = vector.load %arg8[%c24, %c0_31] : memref<50x16xf32, #tpu.memory_space<vmem>>, vector<2x16xf32>
    %c0_32 = arith.constant 0 : index
    %c160 = arith.constant 160 : index
    %30 = vector.load %arg9[%c0_32, %c160] : memref<2x256xf32, #tpu.memory_space<vmem>>, vector<2x16xf32>
    tpu.vector_store %arg9[%c0_32, %c160], %29 {strides = array<i32>} : memref<2x256xf32, #tpu.memory_space<vmem>>, vector<2x16xf32>,
    %c26 = arith.constant 26 : index
    %c0_33 = arith.constant 0 : index
    %31 = vector.load %arg8[%c26, %c0_33] : memref<50x16xf32, #tpu.memory_space<vmem>>, vector<2x16xf32>
    %c0_34 = arith.constant 0 : index
    %c176 = arith.constant 176 : index
    %32 = vector.load %arg9[%c0_34, %c176] : memref<2x256xf32, #tpu.memory_space<vmem>>, vector<2x16xf32>
    tpu.vector_store %arg9[%c0_34, %c176], %31 {strides = array<i32>} : memref<2x256xf32, #tpu.memory_space<vmem>>, vector<2x16xf32>,
    %c30 = arith.constant 30 : index
    %c0_35 = arith.constant 0 : index
    %33 = vector.load %arg8[%c30, %c0_35] : memref<50x16xf32, #tpu.memory_space<vmem>>, vector<2x16xf32>
    %c0_36 = arith.constant 0 : index
    %c192 = arith.constant 192 : index
    %34 = vector.load %arg9[%c0_36, %c192] : memref<2x256xf32, #tpu.memory_space<vmem>>, vector<2x16xf32>
    tpu.vector_store %arg9[%c0_36, %c192], %33 {strides = array<i32>} : memref<2x256xf32, #tpu.memory_space<vmem>>, vector<2x16xf32>,
    %c32_37 = arith.constant 32 : index
    %c0_38 = arith.constant 0 : index
    %35 = vector.load %arg8[%c32_37, %c0_38] : memref<50x16xf32, #tpu.memory_space<vmem>>, vector<2x16xf32>
    %c0_39 = arith.constant 0 : index
    %c208 = arith.constant 208 : index
    %36 = vector.load %arg9[%c0_39, %c208] : memref<2x256xf32, #tpu.memory_space<vmem>>, vector<2x16xf32>
    tpu.vector_store %arg9[%c0_39, %c208], %35 {strides = array<i32>} : memref<2x256xf32, #tpu.memory_space<vmem>>, vector<2x16xf32>,
    %c34 = arith.constant 34 : index
    %c0_40 = arith.constant 0 : index
    %37 = vector.load %arg8[%c34, %c0_40] : memref<50x16xf32, #tpu.memory_space<vmem>>, vector<2x16xf32>
    %c0_41 = arith.constant 0 : index
    %c224 = arith.constant 224 : index
    %38 = vector.load %arg9[%c0_41, %c224] : memref<2x256xf32, #tpu.memory_space<vmem>>, vector<2x16xf32>
    tpu.vector_store %arg9[%c0_41, %c224], %37 {strides = array<i32>} : memref<2x256xf32, #tpu.memory_space<vmem>>, vector<2x16xf32>,
    %c36 = arith.constant 36 : index
    %c0_42 = arith.constant 0 : index
    %39 = vector.load %arg8[%c36, %c0_42] : memref<50x16xf32, #tpu.memory_space<vmem>>, vector<2x16xf32>
    %c0_43 = arith.constant 0 : index
    %c240 = arith.constant 240 : index
    %40 = vector.load %arg9[%c0_43, %c240] : memref<2x256xf32, #tpu.memory_space<vmem>>, vector<2x16xf32>
    tpu.vector_store %arg9[%c0_43, %c240], %39 {strides = array<i32>} : memref<2x256xf32, #tpu.memory_space<vmem>>, vector<2x16xf32>,
    %c0_44 = arith.constant 0 : index
    %c0_45 = arith.constant 0 : index
    %41 = vector.load %arg9[%c0_44, %c0_45] : memref<2x256xf32, #tpu.memory_space<vmem>>, vector<2x256xf32>
    %c0_46 = arith.constant 0 : index
    %c0_47 = arith.constant 0 : index
    %42 = vector.load %arg3[%c0_46, %c0_47] : memref<256x32xf32, #tpu.memory_space<vmem>>, vector<256x32xf32>
    %cst_48 = arith.constant dense<0.000000e+00> : vector<2x32xf32>
    %43 = tpu.matmul %41, %42, %cst_48 {dimension_numbers = #tpu.dot_dimension_numbers<[1], [0], [0], [1], [0, 0, 1, 1], [], []>} : vector<2x256xf32>, vector<256x32xf32>, vector<2x32xf32> -> vector<2x32xf32>
    %c0_49 = arith.constant 0 : index
    %c0_50 = arith.constant 0 : index
    %44 = vector.load %arg4[%c0_49, %c0_50] : memref<1x32xf32, #tpu.memory_space<vmem>>, vector<1x32xf32>
    %45 = vector.broadcast %44 : vector<1x32xf32> to vector<2x32xf32>
    %46 = arith.addf %43, %45 : vector<2x32xf32>
    %cst_51 = arith.constant 0.000000e+00 : f32
    %47 = vector.broadcast %cst_51 : f32 to vector<2x32xf32>
    %48 = arith.maximumf %46, %47 : vector<2x32xf32>
    %c0_52 = arith.constant 0 : index
    %c0_53 = arith.constant 0 : index
    %49 = vector.load %arg5[%c0_52, %c0_53] : memref<32x24xf32, #tpu.memory_space<vmem>>, vector<32x24xf32>
    %cst_54 = arith.constant dense<0.000000e+00> : vector<2x24xf32>
    %50 = tpu.matmul %48, %49, %cst_54 {dimension_numbers = #tpu.dot_dimension_numbers<[1], [0], [0], [1], [0, 0, 1, 1], [], []>} : vector<2x32xf32>, vector<32x24xf32>, vector<2x24xf32> -> vector<2x24xf32>
    %c0_55 = arith.constant 0 : index
    %c0_56 = arith.constant 0 : index
    %51 = vector.load %arg6[%c0_55, %c0_56] : memref<1x24xf32, #tpu.memory_space<vmem>>, vector<1x24xf32>
    %52 = vector.broadcast %51 : vector<1x24xf32> to vector<2x24xf32>
    %53 = arith.addf %50, %52 : vector<2x24xf32>
    %cst_57 = arith.constant 0.000000e+00 : f32
    %54 = vector.broadcast %cst_57 : f32 to vector<2x24xf32>
    %55 = arith.maximumf %53, %54 : vector<2x24xf32>
    %c0_58 = arith.constant 0 : index
    %c0_59 = arith.constant 0 : index
    %56 = vector.load %arg7[%c0_58, %c0_59] : memref<2x24xf32, #tpu.memory_space<vmem>>, vector<2x24xf32>
    tpu.vector_store %arg7[%c0_58, %c0_59], %55 {strides = array<i32>} : memref<2x24xf32, #tpu.memory_space<vmem>>, vector<2x24xf32>,
    return
  }
}

</mosaic_0001>

<bundles_post_ra>
// kernel: small_cnn_forward.1
= control target key start
LH: loop header
LB: loop body
LE: loop exit
PB: predicated region body
PF: predicated region fallthrough
CT: control target
= control target key end

     0   :  { %s1184_s0 = inlined_call_operand.vmem [shape: f32[50,256], index: 0, kind: input, shape index: {}]   ;;  %s1185_s1 = inlined_call_operand.vmem [shape: f32[256,16], index: 1, kind: input, shape index: {}]   ;;  %s1186_s2 = inlined_call_operand.vmem [shape: f32[1,16], index: 2, kind: input, shape index: {}]   ;;  %s1187_s3 = inlined_call_operand.vmem [shape: f32[256,32], index: 3, kind: input, shape index: {}]   ;;  %s1188_s4 = inlined_call_operand.vmem [shape: f32[1,32], index: 4, kind: input, shape index: {}]   ;;  %s1189_s5 = inlined_call_operand.vmem [shape: f32[32,24], index: 5, kind: input, shape index: {}]   ;;  %s1190_s6 = inlined_call_operand.vmem [shape: f32[1,24], index: 6, kind: input, shape index: {}]   ;;  %s1191_s7 = inlined_call_operand.hbm [shape: f32[2,24], index: 7, kind: output, shape index: {}]  }
   0x1   :  { %v57_v0 = vld [vmem:[%s1185_s1 + $0x80] sm:$0xff]  ;;  %v58_v1 = vld [vmem:[%s1185_s1 + $0x88] sm:$0xff]  ;;  %v59_v5 = vld [vmem:[%s1185_s1 + $0x90] sm:$0xff] }
   0x2   :  { %v41_v2 = vld [vmem:[%s1185_s1] sm:$0xff]  ;;  %v736_v3 = vpack.c.bf16 %v58_v1, %v57_v0  ;;  %v42_v4 = vld [vmem:[%s1185_s1 + $0x8] sm:$0xff]  ;;  %v60_v6 = vld [vmem:[%s1185_s1 + $0x98] sm:$0xff] }
   0x3   :  { %v738_v7 = vpack.c.bf16 %v42_v4, %v41_v2  ;;  %v740_v8 = vpack.c.bf16 %v60_v6, %v59_v5  ;;  %v43_v9 = vld [vmem:[%s1185_s1 + $0x10] sm:$0xff]  ;;  %v44_v10 = vld [vmem:[%s1185_s1 + $0x18] sm:$0xff]  ;;  %v61_v11 = vld [vmem:[%s1185_s1 + $0xa0] sm:$0xff] }
   0x4   :  { %737 = vmatprep.subr.bf16.mxu0 %v736_v3  ;;  %v62_v12 = vld [vmem:[%s1185_s1 + $0xa8] sm:$0xff]  ;;  %v742_v13 = vpack.c.bf16 %v44_v10, %v43_v9  ;;  %v45_v15 = vld [vmem:[%s1185_s1 + $0x20] sm:$0xff]  ;;  %v63_v17 = vld [vmem:[%s1185_s1 + $0xb0] sm:$0xff] }
   0x5   :  { %739 = vmatpush3.bf16.msra.mxu0 %v738_v7  ;;  %v744_v14 = vpack.c.bf16 %v62_v12, %v61_v11  ;;  %v46_v16 = vld [vmem:[%s1185_s1 + $0x28] sm:$0xff]  ;;  %v64_v18 = vld [vmem:[%s1185_s1 + $0xb8] sm:$0xff]  ;;  %v47_v21 = vld [vmem:[%s1185_s1 + $0x30] sm:$0xff] }
   0x6   :  { %741 = vmatprep.subr.bf16.mxu0 %v740_v8  ;;  %v746_v19 = vpack.c.bf16 %v46_v16, %v45_v15  ;;  %v748_v20 = vpack.c.bf16 %v64_v18, %v63_v17  ;;  %v48_v22 = vld [vmem:[%s1185_s1 + $0x38] sm:$0xff]  ;;  %v65_v23 = vld [vmem:[%s1185_s1 + $0xc0] sm:$0xff]  ;;  %v66_v24 = vld [vmem:[%s1185_s1 + $0xc8] sm:$0xff] }
   0x7   :  { %v28_v25 = vld [vmem:[%s1184_s0 + $0x8] sm:$0xff]  ;;  %v750_v26 = vpack.c.bf16 %v48_v22, %v47_v21  ;;  %v752_v27 = vpack.c.bf16 %v66_v24, %v65_v23  ;;  %v49_v28 = vld [vmem:[%s1185_s1 + $0x40] sm:$0xff]  ;;  %v67_v30 = vld [vmem:[%s1185_s1 + $0xd0] sm:$0xff] }
   0x8   :  { %144 = vmatprep.mubr.f32.mxu0 %v28_v25  ;;  %v50_v29 = vld [vmem:[%s1185_s1 + $0x48] sm:$0xff]  ;;  %v68_v31 = vld [vmem:[%s1185_s1 + $0xd8] sm:$0xff] }
   0x9   :  { %743 = vmatpush3.bf16.msra.mxu0 %v742_v13 }
   0xa   :  { %745 = vmatprep.subr.bf16.mxu0 %v744_v14 }
   0xd   :  { %747 = vmatpush3.bf16.msra.mxu0 %v746_v19 }
   0xe   :  { %749 = vmatprep.subr.bf16.mxu0 %v748_v20 }
   0xf   :  { %12 = vsyncpa [#allocation5], 0  ;;  %v754_v32 = vpack.c.bf16 %v50_v29, %v49_v28  ;;  %v756_v33 = vpack.c.bf16 %v68_v31, %v67_v30  ;;  %v51_v34 = vld [vmem:[%s1185_s1 + $0x50] sm:$0xff]  ;;  %v52_v35 = vld [vmem:[%s1185_s1 + $0x58] sm:$0xff]  ;;  %vm187_vm0 = vcmask 130048   ;;  %vm194_vm1 = vcmask 123904  }
  0x10   :  { %v69_v36 = vld [vmem:[%s1185_s1 + $0xe0] sm:$0xff]  ;;  %v70_v37 = vld [vmem:[%s1185_s1 + $0xe8] sm:$0xff]  ;;  %v758_v38 = vpack.c.bf16 %v52_v35, %v51_v34  ;;  %v71_v42 = vld [vmem:[%s1185_s1 + $0xf0] sm:$0xff]  ;;  %s841_s24 = smov 32   ;;  %s842_s27 = smov 16   ;;  %vm210_vm2 = vcmask 255104  }
  0x11   :  { %751 = vmatpush3.bf16.msra.mxu0 %v750_v26  ;;  %v760_v39 = vpack.c.bf16 %v70_v37, %v69_v36  ;;  %v53_v40 = vld [vmem:[%s1185_s1 + $0x60] sm:$0xff]  ;;  %v54_v41 = vld [vmem:[%s1185_s1 + $0x68] sm:$0xff]  ;;  %v72_v43 = vld [vmem:[%s1185_s1 + $0xf8] sm:$0xff]  ;;  %s843_s10 = smov 48   ;;  %s844_s20 = smov 64   ;;  %vm224_vm3 = vcmask 386304  }
  0x12   :  { %753 = vmatprep.subr.bf16.mxu0 %v752_v27  ;;  %v762_v44 = vpack.c.bf16 %v54_v41, %v53_v40  ;;  %v764_v45 = vpack.c.bf16 %v72_v43, %v71_v42  ;;  %v55_v46 = vld [vmem:[%s1185_s1 + $0x70] sm:$0xff]  ;;  %v56_v47 = vld [vmem:[%s1185_s1 + $0x78] sm:$0xff]  ;;  %v27_v49 = vld [vmem:[%s1184_s0] sm:$0xff]  ;;  %s845_s9 = smov 80   ;;  %s846_s12 = smov 96   ;;  %vm238_vm4 = vcmask 517504  }
  0x13   :  { %v766_v48 = vpack.c.bf16 %v56_v47, %v55_v46  ;;  %v30_v50 = vld [vmem:[%s1184_s0 + $0x18] sm:$0xff]  ;;  %v29_v51 = vld [vmem:[%s1184_s0 + $0x10] sm:$0xff]  ;;  %v32_v52 = vld [vmem:[%s1184_s0 + $0x28] sm:$0xff]  ;;  %s847_s15 = smov 112   ;;  %vm252_vm5 = vcmask 648704   ;;  %vm266_vm6 = vcmask 779904  }
  0x14   :  { %v31_v53 = vld [vmem:[%s1184_s0 + $0x20] sm:$0xff]  ;;  %v34_v54 = vld [vmem:[%s1184_s0 + $0x38] sm:$0xff]  ;;  %v33_v55 = vld [vmem:[%s1184_s0 + $0x30] sm:$0xff]  ;;  %vm280_vm7 = vcmask 911104   ;;  %vm294_vm8 = vcmask 1042304   ;;  %vm849_vm9 = vmmov 0  }
  0x15   :  { %755 = vmatpush3.bf16.msra.mxu0 %v754_v32  ;;  %v36_v56 = vld [vmem:[%s1184_s0 + $0x48] sm:$0xff]  ;;  %v35_v57 = vld [vmem:[%s1184_s0 + $0x40] sm:$0xff]  ;;  %v408_v24 = vld [vmem:[%s1187_s3 + $0x90] sm:$0xff]  ;;  %vm522_vm10 = vcmask 261120   ;;  %s851_s8 = smov [#allocation4]   ;;  %vm597_vm11 = vcmask 189440  }
  0x16   :  { %757 = vmatprep.subr.bf16.mxu0 %v756_v33  ;;  %v613_v59 = vld [vmem:[%s1186_s2] ss:$0 sm:$0xff]  ;;  %v407_v11 = vld [vmem:[%s1187_s3 + $0x88] sm:$0xff]  ;;  %v409_v26 = vld [vmem:[%s1187_s3 + $0x98] sm:$0xff]  ;;  %s605_s11 = sshll.u32 %s851_s8, 4  ;;  %s606_s11 = int_to_ptr.vmem [resolvable:$true] %s605_s11 }
  0x17   :  { %v406_v10 = vld [vmem:[%s1187_s3 + $0x80] sm:$0xff]  ;;  %v391_v17 = vld [vmem:[%s1187_s3 + $0x8] sm:$0xff]  ;;  %v772_v29 = vpack.c.bf16 %v409_v26, %v408_v24  ;;  %v392_v30 = vld [vmem:[%s1187_s3 + $0x10] sm:$0xff]  ;;  %p822_p1 = scmp.lt.s32.totalorder %s606_s11, %s606_s11 }
  0x18   :  { %v768_v13 = vpack.c.bf16 %v407_v11, %v406_v10  ;;  %v390_v16 = vld [vmem:[%s1187_s3] sm:$0xff]  ;;  %v393_v31 = vld [vmem:[%s1187_s3 + $0x18] sm:$0xff]  ;;  %v411_v36 = vld [vmem:[%s1187_s3 + $0xa8] sm:$0xff] }
  0x19   :  { %759 = vmatpush3.bf16.msra.mxu0 %v758_v38  ;;  %v770_v20 = vpack.c.bf16 %v391_v17, %v390_v16  ;;  %v774_v32 = vpack.c.bf16 %v393_v31, %v392_v30  ;;  %v410_v35 = vld [vmem:[%s1187_s3 + $0xa0] sm:$0xff]  ;;  %v395_v40 = vld [vmem:[%s1187_s3 + $0x28] sm:$0xff]  ;;  %v396_v47 = vld [vmem:[%s1187_s3 + $0x30] sm:$0xff] }
  0x1a   :  { %761 = vmatprep.subr.bf16.mxu0 %v760_v39  ;;  %769 = vmatprep.subr.bf16.mxu1 %v768_v13  ;;  %v776_v38 = vpack.c.bf16 %v411_v36, %v410_v35  ;;  %v394_v39 = vld [vmem:[%s1187_s3 + $0x20] sm:$0xff]  ;;  %v421_v10 = vld [vmem:[%s1187_s3 + $0xf8] sm:$0xff] }
  0x1b   :  { %771 = vmatpush3.bf16.msra.mxu1 %v770_v20  ;;  %v778_v42 = vpack.c.bf16 %v395_v40, %v394_v39  ;;  %v848_v39 = vmov 0.0|0.0   ;;  %v512_v40 = vld [vmem:[%s1189_s5 + $0x8] sm:$0xff] }
  0x1c   :  { %773 = vmatprep.subr.bf16.mxu1 %v772_v29 }
  0x1d   :  { %763 = vmatpush3.bf16.msra.mxu0 %v762_v44  ;;  %v412_v44 = vld [vmem:[%s1187_s3 + $0xb0] sm:$0xff] }
  0x1e   :  { %765 = vmatprep.subr.bf16.mxu0 %v764_v45  ;;  %v413_v45 = vld [vmem:[%s1187_s3 + $0xb8] sm:$0xff] }
  0x1f   :  { %775 = vmatpush3.bf16.msra.mxu1 %v774_v32  ;;  %v780_v46 = vpack.c.bf16 %v413_v45, %v412_v44  ;;  %v40_v44 = vld [vmem:[%s1184_s0 + $0x68] sm:$0x3] }
  0x20   :  { %777 = vmatprep.subr.bf16.mxu1 %v776_v38  ;;  %v511_v38 = vld [vmem:[%s1189_s5] sm:$0xff] }
  0x21   :  { %767 = vmatpush3.bf16.msra.mxu0 %v766_v48  ;;  %v397_v48 = vld [vmem:[%s1187_s3 + $0x38] sm:$0xff] }
  0x23   :  { %779 = vmatpush3.bf16.msra.mxu1 %v778_v42  ;;  %v513_v42 = vld [vmem:[%s1189_s5 + $0x10] sm:$0xff] }
  0x24   :  { %145 = vmatmul.mubr.f32.vlgmr.msra.gmra.mrb[0].mxu0 %v27_v49  ;;  %781 = vmatprep.subr.bf16.mxu1 %v780_v46  ;;  %v39_v46 = vld [vmem:[%s1184_s0 + $0x60] sm:$0x3] }
  0x25   :  { %149 = vmatprep.mubr.f32.mxu0 %v30_v50  ;;  %v782_v50 = vpack.c.bf16 %v397_v48, %v396_v47  ;;  %v850_v47 = vmov 0.0  }
  0x27   :  { %783 = vmatpush3.bf16.msra.mxu1 %v782_v50 }
  0x28   :  { %150 = vmatmul.mubr.f32.gmra.mrb[2].mxu0 %v29_v51 }
  0x29   :  { %154 = vmatprep.mubr.f32.mxu0 %v32_v52  ;;  %v414_v52 = vld [vmem:[%s1187_s3 + $0xc0] sm:$0xff] }
  0x2c   :  { %155 = vmatmul.mubr.f32.gmra.mrb[4].mxu0 %v31_v53  ;;  %v415_v53 = vld [vmem:[%s1187_s3 + $0xc8] sm:$0xff] }
  0x2d   :  { %159 = vmatprep.mubr.f32.mxu0 %v34_v54  ;;  %v784_v54 = vpack.c.bf16 %v415_v53, %v414_v52 }
  0x2f   :  { %785 = vmatprep.subr.bf16.mxu1 %v784_v54 }
  0x30   :  { %160 = vmatmul.mubr.f32.gmra.mrb[6].mxu0 %v33_v55  ;;  %v398_v55 = vld [vmem:[%s1187_s3 + $0x40] sm:$0xff] }
  0x31   :  { %164 = vmatprep.mubr.f32.mxu0 %v36_v56  ;;  %v399_v56 = vld [vmem:[%s1187_s3 + $0x48] sm:$0xff] }
  0x34   :  { %165 = vmatmul.mubr.f32.gmra.mrb[8].mxu0 %v35_v57 }
  0xf7   :  { %v664_v58 = vpop.f32.mrb[0].mxu0 }
  0xf8   :  { %v665_v60 = vpop.f32.mrb[1].mxu0 }
  0xf9   :  { %v666_v61 = vadd.f32 %v665_v60, %v664_v58  ;;  %v786_v58 = vpack.c.bf16 %v399_v56, %v398_v55  ;;  %v417_v60 = vld [vmem:[%s1187_s3 + $0xd8] sm:$0xff] }
  0xfb   :  { %v147_v62 = vadd.f32 %v666_v61, %v613_v59  ;;  %v667_v63 = vpop.f32.mrb[2].mxu0  ;;  %787 = vmatpush3.bf16.msra.mxu1 %v786_v58  ;;  %v630_v58 = vld [vmem:[%s1190_s6] ss:$0 sm:$0xff] }
  0xfc   :  { %v668_v0 = vpop.f32.mrb[3].mxu0 }
  0xfd   :  { %v180_v1 = vmax.f32 %v147_v62, 0.0  ;;  %v669_v2 = vadd.f32 %v668_v0, %v667_v63 }
  0xff   :  { %188 = vst.msk [vmem:[#allocation2] sm:$0xff] %vm187_vm0, %v180_v1  ;;  %v152_v3 = vadd.f32 %v669_v2, %v613_v59  ;;  %v670_v4 = vpop.f32.mrb[4].mxu0  ;;  %v400_v1 = vld [vmem:[%s1187_s3 + $0x50] sm:$0xff]  ;;  %v401_v2 = vld [vmem:[%s1187_s3 + $0x58] sm:$0xff] }
 0x100   :  { %v671_v5 = vpop.f32.mrb[5].mxu0 }
 0x101   :  { %v181_v6 = vmax.f32 %v152_v3, 0.0  ;;  %v672_v7 = vadd.f32 %v671_v5, %v670_v4  ;;  %v790_v3 = vpack.c.bf16 %v401_v2, %v400_v1  ;;  %v418_v4 = vld [vmem:[%s1187_s3 + $0xe0] sm:$0xff]  ;;  %v419_v5 = vld [vmem:[%s1187_s3 + $0xe8] sm:$0xff] }
 0x103   :  { %189 = vst.msk [vmem:[#allocation2 + $0x8] sm:$0xff] %vm187_vm0, %v181_v6  ;;  %v157_v8 = vadd.f32 %v672_v7, %v613_v59  ;;  %v673_v9 = vpop.f32.mrb[6].mxu0  ;;  %v402_v6 = vld [vmem:[%s1187_s3 + $0x60] sm:$0xff]  ;;  %v792_v7 = vpack.c.bf16 %v419_v5, %v418_v4 }
 0x104   :  { %v674_v12 = vpop.f32.mrb[7].mxu0 }
 0x105   :  { %v182_v14 = vmax.f32 %v157_v8, 0.0  ;;  %v675_v15 = vadd.f32 %v674_v12, %v673_v9  ;;  %v403_v8 = vld [vmem:[%s1187_s3 + $0x68] sm:$0xff]  ;;  %v420_v9 = vld [vmem:[%s1187_s3 + $0xf0] sm:$0xff] }
 0x106   :  { %v615_v18 = vld.sshfl [vmem:[#allocation2 + $0x4] sm:$0x3 pattern:$0x76325410]  ;;  %v196_v19 = vld [vmem:[#allocation2] sm:$0x3]  ;;  %v794_v12 = vpack.c.bf16 %v403_v8, %v402_v6  ;;  %v796_v13 = vpack.c.bf16 %v421_v10, %v420_v9 }
 0x107   :  { %190 = vst.msk [vmem:[#allocation2 + $0x10] sm:$0xff] %vm187_vm0, %v182_v14  ;;  %v162_v21 = vadd.f32 %v675_v15, %v613_v59  ;;  %221 = vrot.lane.b32.xlu1 %v615_v18, %s841_s24  ;;  %v614_v22 = vld.sshfl [vmem:[#allocation2 + $0x2] sm:$0x3 pattern:$0x76325410]  ;;  %v676_v23 = vpop.f32.mrb[8].mxu0 }
 0x108   :  { %197 = vst.msk [vmem:[#allocation3] sm:$0x3] %vm194_vm1, %v196_v19  ;;  %207 = vrot.lane.b32.xlu0 %v614_v22, %s842_s27  ;;  %v677_v25 = vpop.f32.mrb[9].mxu0  ;;  %v404_v14 = vld [vmem:[%s1187_s3 + $0x70] sm:$0xff]  ;;  %v405_v15 = vld [vmem:[%s1187_s3 + $0x78] sm:$0xff] }
 0x109   :  { %v183_v27 = vmax.f32 %v162_v21, 0.0  ;;  %v678_v28 = vadd.f32 %v677_v25, %v676_v23  ;;  %v616_v33 = vld.sshfl [vmem:[#allocation2 + $0x6] sm:$0x3 pattern:$0x76325410]  ;;  %v798_v17 = vpack.c.bf16 %v405_v15, %v404_v14  ;;  %v38_v19 = vld [vmem:[%s1184_s0 + $0x58] sm:$0xff] }
 0x10a   :  { %v617_v43 = vld.sshfl [vmem:[#allocation2 + $0xa] sm:$0x3 pattern:$0x76325410]  ;;  %169 = vmatprep.mubr.f32.mxu0 %v38_v19 }
 0x10b   :  { %191 = vst.msk [vmem:[#allocation2 + $0x18] sm:$0xff] %vm187_vm0, %v183_v27  ;;  %v167_v34 = vadd.f32 %v678_v28, %v613_v59  ;;  %v618_v51 = vld.sshfl [vmem:[#allocation2 + $0xc] sm:$0x3 pattern:$0x76325410]  ;;  %v416_v59 = vld [vmem:[%s1187_s3 + $0xd0] sm:$0xff] }
 0x10c   :  { %235 = vrot.lane.b32.xlu0 %v616_v33, %s843_s10  ;;  %v788_v62 = vpack.c.bf16 %v417_v60, %v416_v59  ;;  %v619_v0 = vld.sshfl [vmem:[#allocation2 + $0xe] sm:$0x3 pattern:$0x76325410] }
 0x10d   :  { %v184_v37 = vmax.f32 %v167_v34, 0.0 }
 0x10e   :  { %v296_v41 = vld [vmem:[#allocation2 + $0x14] sm:$0x3]  ;;  %v621_v61 = vld.sshfl [vmem:[#allocation2 + $0x16] sm:$0x3 pattern:$0x76325410]  ;;  %789 = vmatprep.subr.bf16.mxu1 %v788_v62 }
 0x10f   :  { %192 = vst.msk [vmem:[#allocation2 + $0x20] sm:$0xff] %vm187_vm0, %v184_v37  ;;  %791 = vmatpush3.bf16.msra.mxu1 %v790_v3  ;;  %v620_v16 = vld.sshfl [vmem:[#allocation2 + $0x10] sm:$0x3 pattern:$0x76325410] }
 0x110   :  { %297 = vst.msk [vmem:[#allocation3 + $0x2] sm:$0x3] %vm194_vm1, %v296_v41  ;;  %249 = vrot.lane.b32.xlu0 %v617_v43, %s844_s20  ;;  %793 = vmatprep.subr.bf16.mxu1 %v792_v7  ;;  %v37_v37 = vld [vmem:[%s1184_s0 + $0x50] sm:$0xff]  ;;  %v801_v41 = vpack.c.bf16 %v512_v40, %v511_v38  ;;  %v514_v43 = vld [vmem:[%s1189_s5 + $0x18] sm:$0xff] }
 0x111   :  { %170 = vmatmul.mubr.f32.gmra.mrb[10].mxu0 %v37_v37  ;;  %v804_v45 = vpack.c.bf16 %v514_v43, %v513_v42 }
 0x112   :  { %v622_v49 = vld.sshfl [vmem:[#allocation2 + $0x18] sm:$0x3 pattern:$0x76325410]  ;;  %174 = vmatprep.mubr.f32.mxu0 %v40_v44 }
 0x113   :  { %320 = vrot.lane.b32.xlu1 %v622_v49, %s841_s24  ;;  %v623_v57 = vld.sshfl [vmem:[#allocation2 + $0x1a] sm:$0x3 pattern:$0x76325410]  ;;  %795 = vmatpush3.bf16.msra.mxu1 %v794_v12  ;;  %v628_v49 = vld [vmem:[%s1188_s4] ss:$0 sm:$0xff] }
 0x114   :  { %263 = vrot.lane.b32.xlu0 %v618_v51, %s845_s9  ;;  %v624_v63 = vld.sshfl [vmem:[#allocation2 + $0x1e] sm:$0x3 pattern:$0x76325410]  ;;  %797 = vmatprep.subr.bf16.mxu1 %v796_v13  ;;  %s817_s4 = scalar_lea.vmem %s606_s11, 32 }
 0x115   :  { %175 = vmatmul.mubr.f32.gmra.mrb[12].mxu0 %v39_v46  ;;  %p818_p0 = scmp.ne.s32.totalorder %s606_s11, %s817_s4  ;;  %p823_p2 = scmp.lt.s32.totalorder %s817_s4, %s817_s4 }
 0x116   :  { %v625_v11 = vld.sshfl [vmem:[#allocation2 + $0x20] sm:$0x3 pattern:$0x76325410] }
 0x117   :  { %333 = vrot.lane.b32.xlu1 %v623_v57, %s843_s10  ;;  %v626_v18 = vld.sshfl [vmem:[#allocation2 + $0x22] sm:$0x3 pattern:$0x76325410]  ;;  %799 = vmatpush3.bf16.msra.mxu1 %v798_v17  ;;  %p824_p3 = por %p823_p2, %p822_p1 }
 0x118   :  { %307 = vrot.lane.b32.xlu0 %v621_v61, %s842_s27  ;;  %v627_v20 = vld.sshfl [vmem:[#allocation2 + $0x24] sm:$0x3 pattern:$0x76325410]  ;;  %800 = vmatprep.subr.bf16.mxu1 %v848_v39 }
 0x119   :  { %p825_p4 = pnand %p824_p3, %p818_p0 }
 0x11b   :  { %346 = vrot.lane.b32.xlu1 %v624_v63, %s844_s20 }
 0x11c   :  { %277 = vrot.lane.b32.xlu0 %v619_v0, %s846_s12 }
 0x11f   :  { %359 = vrot.lane.b32.xlu1 %v625_v11, %s845_s9 }
 0x120   :  { %291 = vrot.lane.b32.xlu0 %v620_v16, %s847_s15 }
 0x123   :  { %372 = vrot.lane.b32.xlu1 %v626_v18, %s846_s12 }
 0x127   :  { %385 = vrot.lane.b32.xlu1 %v627_v20, %s847_s15 }
 0x179   :  { %v222_v21 = vpop.permute.xlu1 %221 }
 0x17a   :  { %v208_v22 = vpop.permute.xlu0 %207 }
 0x17b   :  { %211 = vst.msk [vmem:[#allocation3] sm:$0x3] %vm210_vm2, %v208_v22 }
 0x17c   :  { %225 = vst.msk [vmem:[#allocation3] sm:$0x3] %vm224_vm3, %v222_v21 }
 0x17e   :  { %v236_v23 = vpop.permute.xlu0 %235 }
 0x17f   :  { %239 = vst.msk [vmem:[#allocation3] sm:$0x3] %vm238_vm4, %v236_v23 }
 0x182   :  { %v250_v24 = vpop.permute.xlu0 %249 }
 0x183   :  { %253 = vst.msk [vmem:[#allocation3] sm:$0x3] %vm252_vm5, %v250_v24 }
 0x185   :  { %v321_v25 = vpop.permute.xlu1 %320 }
 0x186   :  { %v264_v26 = vpop.permute.xlu0 %263 }
 0x187   :  { %267 = vst.msk [vmem:[#allocation3] sm:$0x3] %vm266_vm6, %v264_v26 }
 0x189   :  { %v334_v27 = vpop.permute.xlu1 %333 }
 0x18a   :  { %v308_v28 = vpop.permute.xlu0 %307 }
 0x18b   :  { %310 = vst.msk [vmem:[#allocation3 + $0x2] sm:$0x3] %vm210_vm2, %v308_v28 }
 0x18c   :  { %323 = vst.msk [vmem:[#allocation3 + $0x2] sm:$0x3] %vm224_vm3, %v321_v25 }
 0x18d   :  { %336 = vst.msk [vmem:[#allocation3 + $0x2] sm:$0x3] %vm238_vm4, %v334_v27  ;;  %v347_v29 = vpop.permute.xlu1 %346 }
 0x18e   :  { %349 = vst.msk [vmem:[#allocation3 + $0x2] sm:$0x3] %vm252_vm5, %v347_v29  ;;  %v278_v30 = vpop.permute.xlu0 %277 }
 0x18f   :  { %281 = vst.msk [vmem:[#allocation3] sm:$0x3] %vm280_vm7, %v278_v30 }
 0x191   :  { %v360_v31 = vpop.permute.xlu1 %359 }
 0x192   :  { %362 = vst.msk [vmem:[#allocation3 + $0x2] sm:$0x3] %vm266_vm6, %v360_v31  ;;  %v292_v32 = vpop.permute.xlu0 %291 }
 0x193   :  { %295 = vst.msk [vmem:[#allocation3] sm:$0x3] %vm294_vm8, %v292_v32 }
 0x195   :  { %v373_v33 = vpop.permute.xlu1 %372 }
 0x196   :  { %375 = vst.msk [vmem:[#allocation3 + $0x2] sm:$0x3] %vm280_vm7, %v373_v33 }
 0x199   :  { %v386_v34 = vpop.permute.xlu1 %385 }
 0x19a   :  { %388 = vst.msk [vmem:[#allocation3 + $0x2] sm:$0x3] %vm294_vm8, %v386_v34 }
 0x1a1   :  { %v629_v35 = vld.sshfl [vmem:[#allocation3] sm:$0x33 pattern:$0x76325410] }
 0x1a2   :  { %v437_v36 = vcombine.high %v629_v35, %v629_v35 }
 0x1a4   :  { %504 = vmatprep.mubr.f32.mxu1 %v437_v36 }
 0x1a5   :  { %505 = vmatmul.mubr.f32.vlgmr.msra.gmra.mrb[0].mxu1 %v629_v35 }
 0x1a6   :  { %802 = vmatpush3.bf16.msra.mxu1 %v801_v41  ;;  %733 = vmatprep.mubr.msk.f32.mxu1 %vm849_vm9, %v850_v47 }
 0x1a7   :  { %803 = vmatprep.subr.bf16.mxu1 %v848_v39 }
 0x1aa   :  { %805 = vmatpush3.bf16.msra.mxu1 %v804_v45 }
 0x1e4   :  { %v679_v54 = vpop.f32.mrb[10].mxu0 }
 0x1e5   :  { %v680_v55 = vpop.f32.mrb[11].mxu0 }
 0x1e8   :  { %v682_v56 = vpop.f32.mrb[12].mxu0 }
 0x1e9   :  { %v683_v57 = vpop.f32.mrb[13].mxu0 }
 0x278   :  { %v717_v48 = vpop.f32.mrb[0].mxu1 }
 0x279   :  { %v718_v50 = vpop.f32.mrb[1].mxu1 }
 0x27a   :  { %v719_v51 = vadd.f32 %v718_v50, %v717_v48 }
 0x27c   :  { %v507_v52 = vadd.f32 %v719_v51, %v628_v49 }
 0x27e   :  { %v510_v53 = vmax.f32 %v507_v52, 0.0 }
 0x280   :  { %734 = vmatmul.mubr.msk.f32.vlgmr.msra.gmra.mrb[2].mxu1 %vm522_vm10, %v510_v53 }
 0x353   :  { %v592_v59 = vpop.f32.mrb[2].mxu1 }
 0x354   :  { %v593_v60 = vadd.f32 %v630_v58, %v592_v59  ;;  %v735_v61 = vpop.f32.mrb[3].mxu1 }
 0x356   :  { %v596_v62 = vmax.f32 %v593_v60, 0.0 }
 0x358   :  { %598 = vst.msk [vmem:[#allocation4] sm:$0x3] %vm597_vm11, %v596_v62 }
 0x359   :  { %828 = shalt.err (!%p825_p4)
}
 0x35a   :  { %s829_s6 = scalar_lea.hbm %s1191_s7, 32 }
 0x35b   :  { %p830_p5 = scmp.ne.s32.totalorder %s1191_s7, %s829_s6  ;;  %p833_p6 = scmp.lt.u32.totalorder %s829_s6, %s1191_s7 }
 0x35d   :  { %p835_p7 = pnand %p833_p6, %p830_p5 }
 0x35f   :  { %838 = shalt.err (!%p835_p7)
}
 0x360   :  { %608 = dma.vmem_to_hbm [thread:$0]  %s606_s11, 32, %s1191_s7, [#allocation5]  }
 0x361   :  { %839 = dma.done.wait [#allocation5], 32  }
 0x362   :  { %840 = vsyncadd [#allocation5], 4294967264 }
 0x363   :  { %612 = vsyncpa [#allocation5], 1 }

</bundles_post_ra>
